<compile_context>
chip_gen: v6e
topology: v6e:2x2x1
jax: 0.10.0
libtpu: 0.0.40
codegen_flags: <defaults>
</compile_context>

<pallas_src>
import functools
import re

import jax
import jax.numpy as jnp
from jax.experimental import pallas as pl
from jax.experimental.pallas import tpu as pltpu


# ----------------------------------------------------------------------------
# Soft-morphology helpers, parameterized by shift(x, axis, d, fill):
#   y[.. i ..] = x[.. i+d ..], out-of-range positions set to `fill`.
# Neutral fills (0 for max, 1 for min) reproduce PyTorch max_pool2d's implicit
# -inf padding because every pooled value lies in [0, 1].
# ----------------------------------------------------------------------------
def _max3(x, axis, shift):
    return jnp.maximum(jnp.maximum(x, shift(x, axis, 1, 0.0)),
                       shift(x, axis, -1, 0.0))


def _min3(x, axis, shift):
    return jnp.minimum(jnp.minimum(x, shift(x, axis, 1, 1.0)),
                       shift(x, axis, -1, 1.0))


def _soft_dilate(x, shift, ah, aw):   # F.max_pool2d(x, (3,3), 1, 1), separable
    return _max3(_max3(x, ah, shift), aw, shift)


def _soft_erode(x, shift, ah, aw):    # min(-maxpool(-x,(3,1)), -maxpool(-x,(1,3)))
    return jnp.minimum(_min3(x, ah, shift), _min3(x, aw, shift))


def _soft_open(x, shift, ah, aw):
    return _soft_dilate(_soft_erode(x, shift, ah, aw), shift, ah, aw)


def _soft_skel_fused(x, n_iter, shift, ah, aw):
    """Soft skeleton with exact erode-reuse: open(y)=dilate(erode(y)) and the
    next iteration's img is exactly erode(y), so each erode is computed once.
    Pooling passes: 2 + 2*n_iter (vs 2 + 3*n_iter for the naive form)."""
    er = _soft_erode(x, shift, ah, aw)
    skel = jnp.maximum(x - _soft_dilate(er, shift, ah, aw), 0.0)
    for _ in range(n_iter):
        img = er
        er = _soft_erode(img, shift, ah, aw)
        delta = jnp.maximum(img - _soft_dilate(er, shift, ah, aw), 0.0)
        skel = skel + jnp.maximum(delta - skel * delta, 0.0)
    return skel


def _soft_skel_ref(x, n_iter, shift, ah, aw):
    """Naive (un-fused) soft skeleton -- reference only, validates the reuse."""
    skel = jnp.maximum(x - _soft_open(x, shift, ah, aw), 0.0)
    img = x
    for _ in range(n_iter):
        img = _soft_erode(img, shift, ah, aw)
        delta = jnp.maximum(img - _soft_open(img, shift, ah, aw), 0.0)
        skel = skel + jnp.maximum(delta - skel * delta, 0.0)
    return skel


# ----------------------------------------------------------------------------
# Hardware probes (cached; one tiny compile each, eager context only)
# ----------------------------------------------------------------------------
@functools.lru_cache(maxsize=1)
def _roll_like_jnp() -> bool:
    """True if pltpu.roll(x, s, ax)[i] == x[(i - s) % n] (jnp.roll convention)."""
    def probe(x_ref, o_ref):
        o_ref[...] = pltpu.roll(x_ref[...], 1, 1)

    x = jnp.broadcast_to(jnp.arange(128, dtype=jnp.float32), (8, 128))
    out = pl.pallas_call(
        probe, out_shape=jax.ShapeDtypeStruct((8, 128), jnp.float32))(x)
    v = float(out[0, 0])
    if v == 127.0:
        return True
    if v == 1.0:
        return False
    raise RuntimeError(f"unexpected pltpu.roll probe value: {v}")


@functools.lru_cache(maxsize=1)
def _tpu_generation() -> int:
    try:
        kind = jax.devices()[0].device_kind.lower()
    except Exception:
        return 0
    m = re.search(r"(\d+)", kind)
    return int(m.group(1)) if m else 0


def _default_pool_dtype():
    # bf16-native VPUs on v6e/v7x; v5e has no bf16 ALU -> keep f32 there.
    return jnp.bfloat16 if _tpu_generation() >= 6 else jnp.float32


def _vmem_capacity_bytes() -> int:
    try:
        return int(pltpu.get_tpu_info().vmem_capacity_bytes)
    except Exception:
        gen = _tpu_generation()
        if 1 <= gen <= 6:
            return 128 * 2**20
        return 64 * 2**20          # conservative (v7x-sized) fallback


def _pick_channels_per_block(c, hp, wp, pool_bytes, budget) -> int:
    """Largest divisor of c whose per-block VMEM estimate fits `budget`."""
    per_ch = hp * wp
    for cpb in range(c, 0, -1):
        if c % cpb:
            continue
        blk = cpb * per_ch
        pipeline = blk * (2 * 4 + 2 * 2)              # pred f32 + truth bf16, x2 buffers
        live = blk * (5 * 4 + 5 * pool_bytes)         # ~5 f32 + ~5 pool-dtype temporaries
        if pipeline + live <= budget:
            return cpb
    # TODO(synk): if even one channel does not fit, H-halo tiling is required.
    return 1


# ----------------------------------------------------------------------------
# Pallas kernel: per-(batch, channel-group) partial sums for BCE + dice + clDice
# ----------------------------------------------------------------------------
def _criterion_kernel(pred_ref, truth_ref, out_ref, *, pos_weight, cl_iter,
                      n_ch, h_pad, h_orig, w_orig, pool_dtype, roll_jnp):
    x = pred_ref[0].astype(jnp.float32)     # (n_ch*Hp, Wp) logits
    t = truth_ref[0].astype(jnp.float32)    # binary labels (bf16 on the wire)
    shp = x.shape
    w_pad = shp[1]

    # --- masks: only vm + the 4 boundary masks stay live past this block -----
    row = jax.lax.broadcasted_iota(jnp.int32, shp, 0)
    col = jax.lax.broadcasted_iota(jnp.int32, shp, 1)
    rmod = row if n_ch == 1 else row % h_pad          # row index within a channel
    bmask = {
        (0, 1): rmod == (h_orig - 1),
        (0, -1): rmod == 0,
        (1, 1): col == (w_orig - 1),
        (1, -1): col == 0,
    }
    padded = (h_pad != h_orig) or (w_pad != w_orig)
    vm = ((rmod < h_orig) & (col < w_orig)).astype(jnp.float32) if padded else None

    def shift(arr, axis, d, fill):
        size = shp[axis]
        amt = (-d) % size if roll_jnp else d % size
        rolled = pltpu.roll(arr, amt, axis)            # XLU rotate, no VMEM copies
        return jnp.where(bmask[(axis, d)], jnp.asarray(fill, arr.dtype), rolled)

    # --- BCE + sigmoid: one exp, one log, one exact divide --------------------
    e = jnp.exp(-jnp.abs(x))
    log1pe = jnp.log(1.0 + e)
    sp_pos = log1pe + jnp.maximum(x, 0.0)              # softplus(x)
    sp_neg = log1pe + jnp.maximum(-x, 0.0)             # softplus(-x)
    bce = pos_weight * t * sp_neg + (1.0 - t) * sp_pos
    p = jnp.where(x >= 0.0, 1.0, e) / (1.0 + e)        # exact, numerically stable
    if padded:
        # Mask at the source: padded truth is exactly 0 (jnp.pad), so every
        # other sum (p*t, t, skel_t, skel_t*p, skel_p*t, skel_p) is then clean.
        bce = bce * vm
        p = p * vm

    # --- eager reductions (shortest possible live ranges) ---------------------
    s_bce = jnp.sum(bce)
    s_pt = jnp.sum(p * t)
    s_p = jnp.sum(p)
    s_t = jnp.sum(t)

    skel_p = _soft_skel_fused(p.astype(pool_dtype), cl_iter, shift, 0, 1)
    skel_p = skel_p.astype(jnp.float32)
    s_spt = jnp.sum(skel_p * t)                         # tprec numerator
    s_sp = jnp.sum(skel_p)                              # tprec denominator

    skel_t = _soft_skel_fused(t.astype(pool_dtype), cl_iter, shift, 0, 1)
    skel_t = skel_t.astype(jnp.float32)
    s_stp = jnp.sum(skel_t * p)                         # tsens numerator
    s_st = jnp.sum(skel_t)                              # tsens denominator

    # One lane-dense (8, 128) partial-sum block per grid step (row k = vals[k]);
    # written once (no read-modify-write), reduced across the grid in JAX.
    vals = (s_bce, s_pt, s_p, s_t, s_spt, s_sp, s_stp, s_st)
    rid = jax.lax.broadcasted_iota(jnp.int32, (8, 128), 0)
    acc = jnp.zeros((8, 128), jnp.float32)
    for k, v in enumerate(vals):
        acc = jnp.where(rid == k, v, acc)
    out_ref[...] = acc


# ----------------------------------------------------------------------------
# Wrapper: layout plumbing + final scalar arithmetic (cheap, plain JAX)
# ----------------------------------------------------------------------------
def seq_criterion(pred, truth, *, bce_weight, bce_pos_weight, cl_dice_weight,
                  cl_dice_iter, alpha=0.5, smooth=1.0, pool_dtype=None):
    if pred.ndim == 5:                        # pred.flatten(0, 1) branch
        pred4 = pred.reshape((-1,) + pred.shape[2:])
        truth4 = truth.reshape((-1,) + truth.shape[2:])
    else:
        pred4, truth4 = pred, truth
    n, c, h, w = pred4.shape
    numel = n * c * h * w                     # BCE mean uses the un-padded count

    # Lane-dense layout: put the spatial dim with less (8,128) padding waste on
    # lanes; the 3x3 soft-morphology is symmetric in H/W so this is exact.
    def _padded_elems(hh, ww):
        return (-(-hh // 8) * 8) * (-(-ww // 128) * 128)
    if _padded_elems(w, h) < _padded_elems(h, w):
        pred4 = jnp.swapaxes(pred4, 2, 3)
        truth4 = jnp.swapaxes(truth4, 2, 3)
        h, w = w, h

    hp = -(-h // 8) * 8
    wp = -(-w // 128) * 128
    if (hp, wp) != (h, w):
        cfg = ((0, 0), (0, 0), (0, hp - h), (0, wp - w))
        pred4 = jnp.pad(pred4, cfg)           # padded truth stays exactly 0
        truth4 = jnp.pad(truth4, cfg)

    # Collapse (C, Hp) so the kernel works on plain 2-D (sublane, lane) tiles.
    pred2 = pred4.reshape(n, c * hp, wp)
    truth2 = truth4.reshape(n, c * hp, wp).astype(jnp.bfloat16)   # binary labels
    # TODO(synk): for soft (non-binary) labels keep truth in f32 here.

    if pool_dtype is None:
        pool_dtype = _default_pool_dtype()
    pool_bytes = jnp.dtype(pool_dtype).itemsize

    vmem_cap = _vmem_capacity_bytes()
    vmem_limit = max(32 * 2**20, int(vmem_cap * 0.78))   # ~100 MiB / ~50 MiB
    cpb = _pick_channels_per_block(c, hp, wp, pool_bytes, int(vmem_limit * 0.85))
    num_cb = c // cpb

    kernel = functools.partial(
        _criterion_kernel,
        pos_weight=float(bce_pos_weight),
        cl_iter=int(cl_dice_iter),
        n_ch=cpb, h_pad=hp, h_orig=h, w_orig=w,
        pool_dtype=pool_dtype,
        roll_jnp=_roll_like_jnp(),
    )

    sums = pl.pallas_call(
        kernel,
        out_shape=jax.ShapeDtypeStruct((n * num_cb * 8, 128), jnp.float32),
        grid=(n, num_cb),
        in_specs=[
            pl.BlockSpec((1, cpb * hp, wp), lambda b, g: (b, g, 0)),
            pl.BlockSpec((1, cpb * hp, wp), lambda b, g: (b, g, 0)),
        ],
        out_specs=pl.BlockSpec((8, 128), lambda b, g: (b * num_cb + g, 0)),
        compiler_params=pltpu.CompilerParams(
            dimension_semantics=("parallel", "parallel"),
            vmem_limit_bytes=int(vmem_limit),
        ),
    )(pred2, truth2)

    s = sums.reshape(n * num_cb, 8, 128)[:, :, 0].sum(axis=0)   # reduce partials
    bce_sum, inter, sum_p, sum_t, sp_t, sp_d, st_p, st_d = [s[k] for k in range(8)]

    loss_bce = bce_sum / numel                                  # mean reduction
    dice = 1.0 - (2.0 * inter + smooth) / (sum_p + sum_t + smooth)
    tprec = (sp_t + smooth) / (sp_d + smooth)
    tsens = (st_p + smooth) / (st_d + smooth)
    cldice = 1.0 - 2.0 * (tprec * tsens) / (tprec + tsens)
    loss_cld = (1.0 - alpha) * dice + alpha * cldice

    total = cl_dice_weight * loss_cld + bce_weight * loss_bce
    return jnp.reshape(total, (1,))                             # matches .unsqueeze(0)


# ----------------------------------------------------------------------------
# Pure-JAX reference (independent, naive formulation, no Pallas)
# ----------------------------------------------------------------------------
def _shift_concat(x, axis, d, fill):
    """Reference-only shift (4-D NCHW): y[..i..] = x[..i+d..], pad with fill."""
    n, c, h, w = x.shape
    if axis == 2:
        pad = jnp.full((n, c, 1, w), fill, x.dtype)
        if d > 0:
            return jnp.concatenate([x[:, :, d:, :], pad], axis=2)
        return jnp.concatenate([pad, x[:, :, :h + d, :]], axis=2)
    pad = jnp.full((n, c, h, 1), fill, x.dtype)
    if d > 0:
        return jnp.concatenate([x[:, :, :, d:], pad], axis=3)
    return jnp.concatenate([pad, x[:, :, :, :w + d]], axis=3)


def _softplus(z):
    return jnp.maximum(z, 0.0) + jnp.log(1.0 + jnp.exp(-jnp.abs(z)))


def _reference_criterion(pred, truth, *, bce_weight, bce_pos_weight,
                         cl_dice_weight, cl_dice_iter, alpha=0.5, smooth=1.0):
    if pred.ndim == 5:
        pred4 = pred.reshape((-1,) + pred.shape[2:])
        truth4 = truth.reshape((-1,) + truth.shape[2:])
    else:
        pred4, truth4 = pred, truth
    x = pred4.astype(jnp.float32)
    t = truth4.astype(jnp.float32)
    loss_bce = jnp.mean(bce_pos_weight * t * _softplus(-x)
                        + (1.0 - t) * _softplus(x))
    p = 1.0 / (1.0 + jnp.exp(-x))
    skel_p = _soft_skel_ref(p, int(cl_dice_iter), _shift_concat, 2, 3)
    skel_t = _soft_skel_ref(t, int(cl_dice_iter), _shift_concat, 2, 3)
    dice = 1.0 - (2.0 * jnp.sum(p * t) + smooth) / (jnp.sum(p) + jnp.sum(t) + smooth)
    tprec = (jnp.sum(skel_p * t) + smooth) / (jnp.sum(skel_p) + smooth)
    tsens = (jnp.sum(skel_t * p) + smooth) / (jnp.sum(skel_t) + smooth)
    cldice = 1.0 - 2.0 * (tprec * tsens) / (tprec + tsens)
    loss_cld = (1.0 - alpha) * dice + alpha * cldice
    return jnp.reshape(cl_dice_weight * loss_cld + bce_weight * loss_bce, (1,))


if __name__ == "__main__":
    key = jax.random.PRNGKey(0)
    k1, k2 = jax.random.split(key)

    # Small shapes consistent with a sequence/UNet segmentation head.
    pred = jax.random.normal(k1, (2, 4, 16, 16), dtype=jnp.float32)        # logits
    truth = (jax.random.uniform(k2, (2, 4, 16, 16)) > 0.7).astype(jnp.float32)

    cfg = dict(bce_weight=1.0, bce_pos_weight=2.0,
               cl_dice_weight=1.0, cl_dice_iter=3)

    pool = _default_pool_dtype()
    try:
        out = jax.block_until_ready(seq_criterion(pred, truth, pool_dtype=pool, **cfg))
    except Exception:
        if pool == jnp.float32:
            raise
        # Lowering-safety fallback: if packed-bf16 sublane rotates are not
        # supported on this chip / jax build, rerun the skeleton chain in f32.
        pool = jnp.float32
        out = jax.block_until_ready(seq_criterion(pred, truth, pool_dtype=pool, **cfg))

    ref = jax.block_until_ready(_reference_criterion(pred, truth, **cfg))

    assert out.shape == (1,), out.shape
    # Looser tolerance when the skeleton chain ran in bf16 (v6e/v7x default).
    rtol, atol = ((2e-2, 2e-3) if pool == jnp.bfloat16 else (2e-3, 1e-4))
    assert jnp.allclose(out, ref, rtol=rtol, atol=atol), (out, ref, pool)
    print("KERNEL_OK")
</pallas_src>

<mosaic_0001>
module attributes {stable_mosaic.version = 11 : i64} {
  func.func @probe(%arg0: memref<8x128xf32, #tpu.memory_space<vmem>>, %arg1: memref<8x128xf32, #tpu.memory_space<vmem>>) attributes {dimension_semantics = [], scalar_prefetch = 0 : i64, scratch_operands = 0 : i64, tpu.core_type = #tpu.core_type<tc>} {
    %c0 = arith.constant 0 : index
    %c0_0 = arith.constant 0 : index
    %0 = vector.load %arg0[%c0, %c0_0] : memref<8x128xf32, #tpu.memory_space<vmem>>, vector<8x128xf32>
    %c1_i32 = arith.constant 1 : i32
    %1 = tpu.dynamic_rotate %0 by %c1_i32 dim 1 : vector<8x128xf32>, i32 -> vector<8x128xf32>
    %c0_1 = arith.constant 0 : index
    %c0_2 = arith.constant 0 : index
    %2 = vector.load %arg1[%c0_1, %c0_2] : memref<8x128xf32, #tpu.memory_space<vmem>>, vector<8x128xf32>
    tpu.vector_store %arg1[%c0_1, %c0_2], %1 {strides = array<i32>} : memref<8x128xf32, #tpu.memory_space<vmem>>, vector<8x128xf32>,
    return
  }
}

</mosaic_0001>

<bundles_post_ra>
// kernel: tpu_custom_call.1
= control target key start
LH: loop header
LB: loop body
LE: loop exit
PB: predicated region body
PF: predicated region fallthrough
CT: control target
= control target key end

     0   :  { %6 = vsyncpa [#allocation3], 0  ;;  %s106_s0 = inlined_call_operand.hbm [shape: f32[8,128], index: 0, kind: input, shape index: {}]   ;;  %s107_s1 = inlined_call_operand.hbm [shape: f32[8,128], index: 1, kind: output, shape index: {}]  }
   0x1   :  { %7 = vsyncpa [#allocation4], 0  ;;  %s87_s6 = smov [#allocation2]  }
   0x2   :  { %s14_s7 = sshll.u32 %s87_s6, 4  ;;  %s15_s7 = int_to_ptr.vmem [resolvable:$true] %s14_s7 }
   0x3   :  { %s51_s8 = scalar_lea.vmem %s15_s7, 128  ;;  %p56_p1 = scmp.lt.s32.totalorder %s15_s7, %s15_s7 }
   0x4   :  { %p52_p0 = scmp.ne.s32.totalorder %s15_s7, %s51_s8  ;;  %p57_p2 = scmp.lt.s32.totalorder %s51_s8, %s51_s8 }
   0x6   :  { %p58_p3 = por %p57_p2, %p56_p1 }
   0x8   :  { %p59_p4 = pnand %p58_p3, %p52_p0 }
   0xa   :  { %62 = shalt.err (!%p59_p4)
}
   0xb   :  { %17 = dma.hbm_to_vmem [thread:$0]  %s106_s0, 128, %s15_s7, [#allocation3]  }
   0xc   :  { %83 = dma.done.wait [#allocation3], 128  }
   0xd   :  { %84 = vsyncadd [#allocation3], 4294967168  ;;  %v21_v0 = vld [vmem:[#allocation2] sm:$0xff]  ;;  %s88_s11 = smov 1   ;;  %s89_s12 = smov [#allocation5]  }
   0xe   :  { %22 = vrot.lane.b32.xlu0 %v21_v0, %s88_s11  ;;  %s31_s13 = sshll.u32 %s89_s12, 4  ;;  %s32_s13 = int_to_ptr.vmem [resolvable:$true] %s31_s13 }
   0xf   :  { %s63_s14 = scalar_lea.vmem %s32_s13, 128  ;;  %p68_p6 = scmp.lt.s32.totalorder %s32_s13, %s32_s13 }
  0x10   :  { %p64_p5 = scmp.ne.s32.totalorder %s32_s13, %s63_s14  ;;  %p69_p7 = scmp.lt.s32.totalorder %s63_s14, %s63_s14 }
  0x12   :  { %p70_p8 = por %p69_p7, %p68_p6 }
  0x14   :  { %p71_p9 = pnand %p70_p8, %p64_p5 }
  0x80   :  { %v23_v1 = vpop.permute.xlu0 %22 }
  0x81   :  { %24 = vst [vmem:[#allocation5] sm:$0xff] %v23_v1 }
  0x82   :  { %74 = shalt.err (!%p71_p9)
}
  0x83   :  { %34 = dma.vmem_to_hbm [thread:$0]  %s32_s13, 128, %s107_s1, [#allocation4]  }
  0x84   :  { %85 = dma.done.wait [#allocation4], 128  }
  0x85   :  { %86 = vsyncadd [#allocation4], 4294967168 }
  0x86   :  { %38 = vsyncpa [#allocation3], 1 }
  0x87   :  { %39 = vsyncpa [#allocation4], 1 }

</bundles_post_ra>
